<compile_context>
chip_gen: v6e
topology: v6e:2x2x1
jax: 0.10.0
libtpu: 0.0.40
codegen_flags: <defaults>
</compile_context>

<pallas_src>
import functools

import jax
import jax.numpy as jnp
from jax.experimental import pallas as pl
from jax.experimental.pallas import tpu as pltpu


def _round_up(a: int, b: int) -> int:
    return (a + b - 1) // b * b


def _fusion_kernel(x_ref, y_ref, wf_ref, bf_ref, wg_ref, bg_ref, o_ref, *,
                   tn, n_col_blocks):
    # x_ref / y_ref : (TM, Dp) row tiles (stored dtype, fed straight to MXU)
    # wf_ref        : (4*Dp, TN) fusion weight slab (z-layout rows)
    # bf_ref        : (1, TN) f32 fusion bias slice
    # wg_ref        : (1, 4*Dp) f32 gate weight row
    # bg_ref        : (1,) f32 gate bias (SMEM scalar)
    # o_ref         : (TM, TN) output tile
    x = x_ref[...]
    y = y_ref[...]
    z = jnp.concatenate([x, y, x * y, x - y], axis=-1)          # (TM, 4*Dp)

    # --- fusion branch: single K=4*Dp MXU matmul, f32 accumulation, bias folded
    f = bf_ref[...] + jnp.dot(z, wf_ref[...],
                              preferred_element_type=jnp.float32)  # (TM, TN)

    # --- gate branch: VPU weighted sum + XLU lane reduction (no MXU) ---
    g = jnp.sum(z * wg_ref[...], axis=-1, keepdims=True) + bg_ref[0]  # (TM,1) f32
    gate = jax.nn.sigmoid(g)            # (TM, 1)  f32 (EUP)
    fusion = jnp.tanh(f)                # (TM, TN) f32 (EUP)

    if n_col_blocks == 1:
        x_out = x
    else:
        col0 = pl.multiple_of(pl.program_id(1) * tn, tn)
        x_out = x_ref[:, pl.ds(col0, tn)]

    # out = gate*fusion + (1-gate)*x  ==  x + gate*(fusion - x)
    o_ref[...] = (x_out + gate * (fusion - x_out)).astype(o_ref.dtype)


def fusion_layer(x, y, w_f, b_f, w_g, b_g, *, tile_rows=None):
    """x, y: [B, S, D].  w_f: [D, 4D] (torch Linear layout), b_f: [D],
    w_g: [1, 4D], b_g: [1].  Returns [B, S, D]."""
    B, S, D = x.shape
    M = B * S
    Dp = _round_up(D, 128)

    act_i = jnp.dtype(x.dtype).itemsize
    wf_arr = jnp.asarray(w_f)
    # bf16 activations -> bf16 weights on the MXU (f32 accumulation).
    wf_dtype = x.dtype if x.dtype == jnp.bfloat16 else wf_arr.dtype
    w_i = jnp.dtype(wf_dtype).itemsize

    # Physical VMEM per TensorCore (v5e/v6e: 128 MiB, v7x: 64 MiB), - headroom.
    try:
        phys_vmem = int(pltpu.get_tpu_info().vmem_capacity_bytes)
    except Exception:
        phys_vmem = 64 << 20
    vmem_cap = max(phys_vmem - (8 << 20), 16 << 20)

    # ---- N-tiling of output features: keep Wf residency <= ~8 MiB / buffer.
    def _pick_tn(budget=8 << 20):
        if 4 * Dp * Dp * w_i <= budget:
            return Dp
        best = 128
        for cand in range(256, Dp, 128):
            if Dp % cand == 0 and 4 * Dp * cand * w_i <= budget:
                best = cand
        return best

    TN = _pick_tn()
    nj = Dp // TN

    def _vmem_est(tm):
        nbuf_w = 1 if nj == 1 else 2
        return int(
            2 * 2 * tm * Dp * act_i                    # x, y (double-buffered)
            + 2 * tm * TN * act_i                      # out  (double-buffered)
            + nbuf_w * (4 * Dp * TN * w_i + TN * 4)    # Wf, bf
            + 4 * Dp * 4                               # gate row
            + 4 * tm * Dp * act_i                      # in-kernel z concat
            + 4 * tm * Dp * 4                          # f32 gate temp (z * wg)
            + 6 * tm * TN * 4                          # f / tanh / blend temps
            + (2 << 20))                               # fudge

    # ---- Row tile selection.
    target = tile_rows if tile_rows is not None else (512 if Dp <= 512 else 256)
    TM = max(8, min(_round_up(int(target), 8), _round_up(M, 8)))
    if M > 8 and -(-M // TM) < 2:          # v7x: give both TensorCores work
        TM = _round_up(-(-M // 2), 8)
    while TM > 8 and _vmem_est(TM) > vmem_cap:
        TM = max(8, _round_up(TM // 2, 8))
    if M % TM != 0:                        # snap to a divisor -> no M-pad copy
        for cand in range(TM, max(8, TM // 4) - 1, -8):
            if M % cand == 0:
                TM = cand
                break
    # TODO(synk): masked ragged-tail path so the M-pad copy can also be skipped
    # when no reasonable divisor tile exists.
    Mp = _round_up(M, TM)

    # ---- Operand plumbing (pad only when actually required).
    x2 = x.reshape(M, D)
    y2 = y.reshape(M, D)
    padded = (Mp != M) or (Dp != D)
    if padded:
        x2 = jnp.pad(x2, ((0, Mp - M), (0, Dp - D)))
        y2 = jnp.pad(y2, ((0, Mp - M), (0, Dp - D)))

    # Wf: torch (D, 4D) -> (4D, D) -> (4, D_in, D_out), pad to (4, Dp, Dp),
    # flatten to (4*Dp, Dp) matching the in-kernel concat layout.
    wf4 = wf_arr.astype(wf_dtype).T.reshape(4, D, D)
    wf4 = jnp.pad(wf4, ((0, 0), (0, Dp - D), (0, Dp - D)))
    wf4 = wf4.reshape(4 * Dp, Dp)
    bf2 = jnp.pad(jnp.asarray(b_f, jnp.float32).reshape(1, D),
                  ((0, 0), (0, Dp - D)))                          # (1, Dp) f32
    wg2 = jnp.pad(jnp.asarray(w_g, jnp.float32).reshape(4, D),
                  ((0, 0), (0, Dp - D))).reshape(1, 4 * Dp)       # (1, 4*Dp)
    bg1 = jnp.asarray(b_g, jnp.float32).reshape(1,)               # SMEM scalar

    vmem_limit = int(min(vmem_cap, max(_vmem_est(TM), 32 << 20)))
    grid = (Mp // TM, nj)
    kern = functools.partial(_fusion_kernel, tn=TN, n_col_blocks=nj)

    def _call(single_buffer_resident):
        res = (dict(pipeline_mode=pl.Buffered(1))
               if single_buffer_resident else {})
        wf_pipe = res if nj == 1 else {}   # N-tiled Wf wants double-buffering
        return pl.pallas_call(
            kern,
            out_shape=jax.ShapeDtypeStruct((Mp, Dp), x.dtype),
            grid_spec=pltpu.PrefetchScalarGridSpec(
                num_scalar_prefetch=0,
                grid=grid,
                in_specs=[
                    pl.BlockSpec((TM, Dp), lambda i, j: (i, 0)),       # x rows
                    pl.BlockSpec((TM, Dp), lambda i, j: (i, 0)),       # y rows
                    pl.BlockSpec((4 * Dp, TN), lambda i, j: (0, j), **wf_pipe),
                    pl.BlockSpec((1, TN), lambda i, j: (0, j), **wf_pipe),
                    pl.BlockSpec((1, 4 * Dp), lambda i, j: (0, 0), **res),
                    pl.BlockSpec(memory_space=pltpu.MemorySpace.SMEM),  # bg
                ],
                out_specs=pl.BlockSpec((TM, TN), lambda i, j: (i, j)),
            ),
            compiler_params=pltpu.CompilerParams(
                dimension_semantics=("parallel", "parallel"),
                vmem_limit_bytes=vmem_limit),
        )(x2, y2, wf4, bf2, wg2, bg1)

    try:
        out2 = _call(True)
    except Exception:
        # Fallback if this jax build rejects single-buffered BlockSpecs.
        out2 = _call(False)

    if padded:
        out2 = out2[:M, :D]
    return out2.reshape(B, S, D)


def fusion_layer_ref(x, y, w_f, b_f, w_g, b_g):
    """Pure-JAX reference mirroring the PyTorch forward."""
    z = jnp.concatenate([x, y, x * y, x - y], axis=2)            # [B,S,4D]
    gate = jax.nn.sigmoid(jnp.einsum("bsk,ok->bso", z, w_g) + b_g)
    fusion = jnp.tanh(jnp.einsum("bsk,ok->bso", z, w_f) + b_f)
    return gate * fusion + (1.0 - gate) * x


if __name__ == "__main__":
    B, S, D = 2, 8, 32
    key = jax.random.PRNGKey(0)
    kx, ky, kwf, kbf, kwg, kbg = jax.random.split(key, 6)

    x = jax.random.normal(kx, (B, S, D), dtype=jnp.float32)
    y = jax.random.normal(ky, (B, S, D), dtype=jnp.float32)

    # Deterministic parameter init (uniform like torch Linear default scale).
    bound = 1.0 / (4 * D) ** 0.5
    w_f = jax.random.uniform(kwf, (D, 4 * D), jnp.float32, -bound, bound)
    b_f = jax.random.uniform(kbf, (D,), jnp.float32, -bound, bound)
    w_g = jax.random.uniform(kwg, (1, 4 * D), jnp.float32, -bound, bound)
    b_g = jax.random.uniform(kbg, (1,), jnp.float32, -bound, bound)

    out = fusion_layer(x, y, w_f, b_f, w_g, b_g)
    out = jax.block_until_ready(out)

    ref = fusion_layer_ref(x, y, w_f, b_f, w_g, b_g)
    assert out.shape == (B, S, D)
    assert jnp.allclose(out, ref, atol=2e-4, rtol=2e-4), "mismatch vs reference"

    print("KERNEL_OK")
</pallas_src>

<mosaic_0001>
module attributes {stable_mosaic.version = 11 : i64} {
  func.func @_fusion_kernel(%arg0: i32, %arg1: i32, %arg2: memref<8x128xf32, #tpu.memory_space<vmem>>, %arg3: memref<8x128xf32, #tpu.memory_space<vmem>>, %arg4: memref<512x128xf32, #tpu.memory_space<vmem>>, %arg5: memref<1x128xf32, #tpu.memory_space<vmem>>, %arg6: memref<1x512xf32, #tpu.memory_space<vmem>>, %arg7: memref<1xf32, #tpu.memory_space<smem>>, %arg8: memref<8x128xf32, #tpu.memory_space<vmem>>) attributes {dimension_semantics = [#tpu.dimension_semantics<parallel>, #tpu.dimension_semantics<parallel>], iteration_bounds = array<i64: 2, 1>, scalar_prefetch = 0 : i64, scratch_operands = 0 : i64, tpu.core_type = #tpu.core_type<tc>, window_params = [{transform_indices = @transform_0, window_bounds = array<i64: 8, 128>}, {transform_indices = @transform_1, window_bounds = array<i64: 8, 128>}, {pipeline_mode = #tpu.pipeline_mode<synchronous>, transform_indices = @transform_2, window_bounds = array<i64: 512, 128>}, {pipeline_mode = #tpu.pipeline_mode<synchronous>, transform_indices = @transform_3, window_bounds = array<i64: 1, 128>}, {pipeline_mode = #tpu.pipeline_mode<synchronous>, transform_indices = @transform_4, window_bounds = array<i64: 1, 512>}, {transform_indices = @transform_5, window_bounds = array<i64: 1>}, {transform_indices = @transform_6, window_bounds = array<i64: 8, 128>}]} {
    %c0 = arith.constant 0 : index
    %c0_0 = arith.constant 0 : index
    %0 = vector.load %arg2[%c0, %c0_0] : memref<8x128xf32, #tpu.memory_space<vmem>>, vector<8x128xf32>
    %c0_1 = arith.constant 0 : index
    %c0_2 = arith.constant 0 : index
    %1 = vector.load %arg3[%c0_1, %c0_2] : memref<8x128xf32, #tpu.memory_space<vmem>>, vector<8x128xf32>
    %2 = arith.mulf %0, %1 : vector<8x128xf32>
    %3 = arith.subf %0, %1 : vector<8x128xf32>
    %4 = tpu.concatenate %0, %1, %2, %3 in 1 : vector<8x128xf32>, vector<8x128xf32>, vector<8x128xf32>, vector<8x128xf32> -> vector<8x512xf32>
    %c0_3 = arith.constant 0 : index
    %c0_4 = arith.constant 0 : index
    %5 = vector.load %arg5[%c0_3, %c0_4] : memref<1x128xf32, #tpu.memory_space<vmem>>, vector<1x128xf32>
    %c0_5 = arith.constant 0 : index
    %c0_6 = arith.constant 0 : index
    %6 = vector.load %arg4[%c0_5, %c0_6] : memref<512x128xf32, #tpu.memory_space<vmem>>, vector<512x128xf32>
    %cst = arith.constant dense<0.000000e+00> : vector<8x128xf32>
    %7 = tpu.matmul %4, %6, %cst {dimension_numbers = #tpu.dot_dimension_numbers<[1], [0], [0], [1], [0, 0, 1, 1], [], []>} : vector<8x512xf32>, vector<512x128xf32>, vector<8x128xf32> -> vector<8x128xf32>
    %8 = vector.broadcast %5 : vector<1x128xf32> to vector<8x128xf32>
    %9 = arith.addf %8, %7 : vector<8x128xf32>
    %c0_7 = arith.constant 0 : index
    %c0_8 = arith.constant 0 : index
    %10 = vector.load %arg6[%c0_7, %c0_8] : memref<1x512xf32, #tpu.memory_space<vmem>>, vector<1x512xf32>
    %11 = vector.broadcast %10 : vector<1x512xf32> to vector<8x512xf32>
    %12 = arith.mulf %4, %11 : vector<8x512xf32>
    %cst_9 = arith.constant dense<0.000000e+00> : vector<8xf32>
    %13 = vector.multi_reduction <add>, %12, %cst_9 [1] : vector<8x512xf32> to vector<8xf32>
    %14 = vector.shape_cast %13 : vector<8xf32> to vector<8x1xf32>
    %c0_10 = arith.constant 0 : index
    %15 = memref.load %arg7[%c0_10] : memref<1xf32, #tpu.memory_space<smem>>
    %16 = vector.broadcast %15 : f32 to vector<8x1xf32>
    %17 = arith.addf %14, %16 : vector<8x1xf32>
    %18 = arith.negf %17 : vector<8x1xf32>
    %19 = math.exp %18 : vector<8x1xf32>
    %cst_11 = arith.constant 1.000000e+00 : f32
    %20 = vector.broadcast %cst_11 : f32 to vector<8x1xf32>
    %21 = arith.addf %20, %19 : vector<8x1xf32>
    %22 = arith.divf %20, %21 : vector<8x1xf32>
    %23 = math.tanh %9 : vector<8x128xf32>
    %24 = arith.subf %23, %0 : vector<8x128xf32>
    %25 = vector.broadcast %22 : vector<8x1xf32> to vector<8x128xf32>
    %26 = arith.mulf %25, %24 : vector<8x128xf32>
    %27 = arith.addf %0, %26 : vector<8x128xf32>
    %c0_12 = arith.constant 0 : index
    %c0_13 = arith.constant 0 : index
    %28 = vector.load %arg8[%c0_12, %c0_13] : memref<8x128xf32, #tpu.memory_space<vmem>>, vector<8x128xf32>
    tpu.vector_store %arg8[%c0_12, %c0_13], %27 {strides = array<i32>} : memref<8x128xf32, #tpu.memory_space<vmem>>, vector<8x128xf32>,
    return
  }
  func.func @transform_0(%arg0: i32, %arg1: i32) -> (i32, i32) {
    %c0_i32 = arith.constant 0 : i32
    %c0_i32_0 = arith.constant 0 : i32
    return %arg0, %c0_i32 : i32, i32
  }
  func.func @transform_1(%arg0: i32, %arg1: i32) -> (i32, i32) {
    %c0_i32 = arith.constant 0 : i32
    %c0_i32_0 = arith.constant 0 : i32
    return %arg0, %c0_i32 : i32, i32
  }
  func.func @transform_2(%arg0: i32, %arg1: i32) -> (i32, i32) {
    %c0_i32 = arith.constant 0 : i32
    %c0_i32_0 = arith.constant 0 : i32
    return %c0_i32, %arg1 : i32, i32
  }
  func.func @transform_3(%arg0: i32, %arg1: i32) -> (i32, i32) {
    %c0_i32 = arith.constant 0 : i32
    %c0_i32_0 = arith.constant 0 : i32
    return %c0_i32, %arg1 : i32, i32
  }
  func.func @transform_4(%arg0: i32, %arg1: i32) -> (i32, i32) {
    %c0_i32 = arith.constant 0 : i32
    %c0_i32_0 = arith.constant 0 : i32
    %c0_i32_1 = arith.constant 0 : i32
    return %c0_i32, %c0_i32_0 : i32, i32
  }
  func.func @transform_5(%arg0: i32, %arg1: i32) -> i32 {
    %c0_i32 = arith.constant 0 : i32
    %c0_i32_0 = arith.constant 0 : i32
    return %c0_i32 : i32
  }
  func.func @transform_6(%arg0: i32, %arg1: i32) -> (i32, i32) {
    %c0_i32 = arith.constant 0 : i32
    return %arg0, %arg1 : i32, i32
  }
}

module attributes {stable_mosaic.version = 11 : i64} {
  func.func @_fusion_kernel(%arg0: i32, %arg1: i32, %arg2: memref<8x128xf32, #tpu.memory_space<vmem>>, %arg3: memref<8x128xf32, #tpu.memory_space<vmem>>, %arg4: memref<512x128xf32, #tpu.memory_space<vmem>>, %arg5: memref<1x128xf32, #tpu.memory_space<vmem>>, %arg6: memref<1x512xf32, #tpu.memory_space<vmem>>, %arg7: memref<1xf32, #tpu.memory_space<smem>>, %arg8: memref<8x128xf32, #tpu.memory_space<vmem>>) attributes {dimension_semantics = [#tpu.dimension_semantics<parallel>, #tpu.dimension_semantics<parallel>], iteration_bounds = array<i64: 2, 1>, scalar_prefetch = 0 : i64, scratch_operands = 0 : i64, tpu.core_type = #tpu.core_type<tc>, window_params = [{transform_indices = @transform_0, window_bounds = array<i64: 8, 128>}, {transform_indices = @transform_1, window_bounds = array<i64: 8, 128>}, {transform_indices = @transform_2, window_bounds = array<i64: 512, 128>}, {transform_indices = @transform_3, window_bounds = array<i64: 1, 128>}, {pipeline_mode = #tpu.pipeline_mode<synchronous>, transform_indices = @transform_4, window_bounds = array<i64: 1, 512>}, {transform_indices = @transform_5, window_bounds = array<i64: 1>}, {transform_indices = @transform_6, window_bounds = array<i64: 8, 128>}]} {
    %c0 = arith.constant 0 : index
    %c0_0 = arith.constant 0 : index
    %0 = vector.load %arg2[%c0, %c0_0] : memref<8x128xf32, #tpu.memory_space<vmem>>, vector<8x128xf32>
    %c0_1 = arith.constant 0 : index
    %c0_2 = arith.constant 0 : index
    %1 = vector.load %arg3[%c0_1, %c0_2] : memref<8x128xf32, #tpu.memory_space<vmem>>, vector<8x128xf32>
    %2 = arith.mulf %0, %1 : vector<8x128xf32>
    %3 = arith.subf %0, %1 : vector<8x128xf32>
    %4 = tpu.concatenate %0, %1, %2, %3 in 1 : vector<8x128xf32>, vector<8x128xf32>, vector<8x128xf32>, vector<8x128xf32> -> vector<8x512xf32>
    %c0_3 = arith.constant 0 : index
    %c0_4 = arith.constant 0 : index
    %5 = vector.load %arg5[%c0_3, %c0_4] : memref<1x128xf32, #tpu.memory_space<vmem>>, vector<1x128xf32>
    %c0_5 = arith.constant 0 : index
    %c0_6 = arith.constant 0 : index
    %6 = vector.load %arg4[%c0_5, %c0_6] : memref<512x128xf32, #tpu.memory_space<vmem>>, vector<512x128xf32>
    %cst = arith.constant dense<0.000000e+00> : vector<8x128xf32>
    %7 = tpu.matmul %4, %6, %cst {dimension_numbers = #tpu.dot_dimension_numbers<[1], [0], [0], [1], [0, 0, 1, 1], [], []>} : vector<8x512xf32>, vector<512x128xf32>, vector<8x128xf32> -> vector<8x128xf32>
    %8 = vector.broadcast %5 : vector<1x128xf32> to vector<8x128xf32>
    %9 = arith.addf %8, %7 : vector<8x128xf32>
    %c0_7 = arith.constant 0 : index
    %c0_8 = arith.constant 0 : index
    %10 = vector.load %arg6[%c0_7, %c0_8] : memref<1x512xf32, #tpu.memory_space<vmem>>, vector<1x512xf32>
    %11 = vector.broadcast %10 : vector<1x512xf32> to vector<8x512xf32>
    %12 = arith.mulf %4, %11 : vector<8x512xf32>
    %cst_9 = arith.constant dense<0.000000e+00> : vector<8xf32>
    %13 = vector.multi_reduction <add>, %12, %cst_9 [1] : vector<8x512xf32> to vector<8xf32>
    %14 = vector.shape_cast %13 : vector<8xf32> to vector<8x1xf32>
    %c0_10 = arith.constant 0 : index
    %15 = memref.load %arg7[%c0_10] : memref<1xf32, #tpu.memory_space<smem>>
    %16 = vector.broadcast %15 : f32 to vector<8x1xf32>
    %17 = arith.addf %14, %16 : vector<8x1xf32>
    %18 = arith.negf %17 : vector<8x1xf32>
    %19 = math.exp %18 : vector<8x1xf32>
    %cst_11 = arith.constant 1.000000e+00 : f32
    %20 = vector.broadcast %cst_11 : f32 to vector<8x1xf32>
    %21 = arith.addf %20, %19 : vector<8x1xf32>
    %22 = arith.divf %20, %21 : vector<8x1xf32>
    %23 = math.tanh %9 : vector<8x128xf32>
    %24 = arith.subf %23, %0 : vector<8x128xf32>
    %25 = vector.broadcast %22 : vector<8x1xf32> to vector<8x128xf32>
    %26 = arith.mulf %25, %24 : vector<8x128xf32>
    %27 = arith.addf %0, %26 : vector<8x128xf32>
    %c0_12 = arith.constant 0 : index
    %c0_13 = arith.constant 0 : index
    %28 = vector.load %arg8[%c0_12, %c0_13] : memref<8x128xf32, #tpu.memory_space<vmem>>, vector<8x128xf32>
    tpu.vector_store %arg8[%c0_12, %c0_13], %27 {strides = array<i32>} : memref<8x128xf32, #tpu.memory_space<vmem>>, vector<8x128xf32>,
    return
  }
  func.func @transform_0(%arg0: i32, %arg1: i32) -> (i32, i32) {
    %c0_i32 = arith.constant 0 : i32
    %c0_i32_0 = arith.constant 0 : i32
    return %arg0, %c0_i32 : i32, i32
  }
  func.func @transform_1(%arg0: i32, %arg1: i32) -> (i32, i32) {
    %c0_i32 = arith.constant 0 : i32
    %c0_i32_0 = arith.constant 0 : i32
    return %arg0, %c0_i32 : i32, i32
  }
  func.func @transform_2(%arg0: i32, %arg1: i32) -> (i32, i32) {
    %c0_i32 = arith.constant 0 : i32
    %c0_i32_0 = arith.constant 0 : i32
    return %c0_i32, %arg1 : i32, i32
  }
  func.func @transform_3(%arg0: i32, %arg1: i32) -> (i32, i32) {
    %c0_i32 = arith.constant 0 : i32
    %c0_i32_0 = arith.constant 0 : i32
    return %c0_i32, %arg1 : i32, i32
  }
  func.func @transform_4(%arg0: i32, %arg1: i32) -> (i32, i32) {
    %c0_i32 = arith.constant 0 : i32
    %c0_i32_0 = arith.constant 0 : i32
    %c0_i32_1 = arith.constant 0 : i32
    return %c0_i32, %c0_i32_0 : i32, i32
  }
  func.func @transform_5(%arg0: i32, %arg1: i32) -> i32 {
    %c0_i32 = arith.constant 0 : i32
    %c0_i32_0 = arith.constant 0 : i32
    return %c0_i32 : i32
  }
  func.func @transform_6(%arg0: i32, %arg1: i32) -> (i32, i32) {
    %c0_i32 = arith.constant 0 : i32
    return %arg0, %arg1 : i32, i32
  }
}

</mosaic_0001>

<bundles_post_ra>
// kernel: tpu_custom_call.1
= control target key start
LH: loop header
LB: loop body
LE: loop exit
PB: predicated region body
PF: predicated region fallthrough
CT: control target
= control target key end

     0   :  { %s1354_s0 = inlined_call_operand.hbm [shape: f32[16,128], index: 0, kind: input, shape index: {}]   ;;  %s1355_s1 = inlined_call_operand.hbm [shape: f32[16,128], index: 1, kind: input, shape index: {}]   ;;  %s1356_s2 = inlined_call_operand.hbm [shape: f32[512,128], index: 2, kind: input, shape index: {}]   ;;  %s1357_s3 = inlined_call_operand.vmem [shape: f32[1,128], index: 3, kind: input, shape index: {}]   ;;  %s1358_s4 = inlined_call_operand.vmem [shape: f32[1,512], index: 4, kind: input, shape index: {}]   ;;  %s1359_s5 = inlined_call_operand.<no memory space> [shape: f32[1], index: 5, kind: input, shape index: {}]   ;;  %s1360_s6 = inlined_call_operand.hbm [shape: f32[16,128], index: 6, kind: output, shape index: {}]  }
   0x1   :  { %1363 = sst [smem:[#allocation16_spill]] %s1356_s2 }
   0x2   :  { %11 = sst [smem:[#allocation2]] %s1359_s5 }
   0x3   :  { %12 = vsyncpa [#allocation4], 0 }
   0x4   :  { %14 = vsyncpa [#allocation4 + $0x1], 0 }
   0x5   :  { %15 = vsyncpa [#allocation7], 0 }
   0x6   :  { %17 = vsyncpa [#allocation7 + $0x1], 0 }
   0x7   :  { %18 = vsyncpa [#allocation5], 0 }
   0x8   :  { %20 = vsyncpa [#allocation5 + $0x1], 0  ;;  %s1148_s23 = smov 0   ;;  %s1150_s24 = smov 0  }
   0x9   :  { %s1152_s25 = smov 0   ;;  %s1154_s26 = smov 0  }
   0xa   :  { %s1156_s27 = smov 0   ;;  %s1158_s28 = smov 0  }
   0xb LB: > { %1364 = sst [smem:[#allocation14_spill]] %s1098_s27  ;;  %s1179_s5 = sadd.s32 4294967295, %s1102_s28   ;;  %s1102_s28 = sphi %s1158_s28, %s26_s28   ;;  %s1098_s27 = sphi %s1156_s27, %s1378_s27   ;;  %s1094_s26 = sphi %s1154_s26, %s1377_s26   ;;  %s1090_s25 = sphi %s1152_s25, %s1381_s25   ;;  %s1086_s24 = sphi %s1150_s24, %s1380_s24   ;;  %s1082_s23 = sphi %s1148_s23, %s1379_s23  }
   0xc   : > { %s756_s29 = sadd.s32 4294967294, %s1102_s28   ;;  %p58_p0 = scmp.ne.s32.totalorder %s1086_s24, %s1082_s23 }
   0xd   : > { %p59_p1 = scmp.eq.s32.totalorder %s1179_s5, 0  ;;  %p210_p3 = scmp.eq.s32.totalorder %s756_s29, 1 }
   0xe   : > { %p757_p5 = scmp.ge.s32.totalorder %s1102_s28, 1  ;;  %p217_p7 = scmp.lt.s32.totalorder %s1102_s28, 3 }
   0xf   : > { %p1188_p4 = por %p59_p1, %p58_p0  ;;  %p1193_p6 = por %p210_p3, %p58_p0 }
  0x10   : > { %p1198_p8 = pnand %p757_p5, %p217_p7  ;;  %s1104_s9 = smov [#allocation8]  }
  0x11   : > { %s1366_s7 = scalar_select %p1193_p6, 1, 0 }
  0x12   : > { %s231_s10 = sshll.u32 %s1104_s9, 4  ;;  %p856_p9 = pneg %p1198_p8  ;;  %s232_s10 = int_to_ptr.vmem [resolvable:$true] %s231_s10 }
  0x13   : > { %s38_s12 = sadd.s32 1, %s1098_s27  ;;  %s943_s13 = scalar_lea.vmem %s232_s10, 8192 }
  0x14   : > { %p1207_p11 = pnand %p856_p9, %p59_p1  ;;  %p944_p13 = scmp.ne.s32.totalorder %s232_s10, %s943_s13 }
  0x15   : > { %p951_p5 = scmp.lt.s32.totalorder %s232_s10, %s232_s10  ;;  %p952_p7 = scmp.lt.s32.totalorder %s943_s13, %s943_s13 }
  0x16   : > { %p934_p12 = pneg %p1207_p11 }
  0x17   : > { %p953_p2 = por %p952_p7, %p951_p5 }
  0x18   : > { %p946_p0 = pnand %p944_p13, %p934_p12 }
  0x1a   : > { %p947_p3 = pneg %p946_p0 }
  0x1c   : > { %p954_p6 = pnand %p953_p2, %p947_p3 }
  0x1e   : > { %957 = shalt.err (!%p954_p6)
}
  0x1f   : > { %s1105_s14 = smov 128   ;;  %s1106_s15 = smov 8  }
  0x20   : > { %s1369_s2 = sld [smem:[#allocation16_spill]]  ;;  %p40_p2 = scmp.ge.s32.totalorder %s38_s12, 2 }
  0x21   : > { %s45_s18 = sadd.s32 1, %s1090_s25  ;;  %p52_p6 = scmp.ne.s32.totalorder %s1090_s25, %s1086_s24 }
  0x22   : > { %p53_p9 = scmp.eq.s32.totalorder %s1102_s28, 0  ;;  %s1383_s12 = smov (%p40_p2, %s38_s12), 0 }
  0x23   : > { %1370 = sst [smem:[#allocation15_spill]] %s1383_s12  ;;  %p1372_p13 = scmp.eq.s32.totalorder %s1179_s5, 1 }
  0x24   : > { %p1225_p12 = por %p53_p9, %p52_p6  ;;  %s42_s21 = ssub.s32 %s1098_s27, %s1383_s12 }
  0x25   : > { %p1231_p0 = por %p1372_p13, %p52_p6  ;;  %p43_p3 = scmp.eq.s32.totalorder %s42_s21, 0 }
  0x26   : > { %859 = dma.hbm_to_vmem [thread:$0]  (!%p1207_p11), %s1369_s2, 8192, %s232_s10, [#allocation7], %s1105_s14, %s1105_s14, %s1106_s15  }
  0x27   : > { %p872_p11 = scmp.lt.s32.totalorder %s1102_s28, 2  ;;  %s257_s22 = sand.u32 1, %s1090_s25  }
  0x28   : > { %s761_s29 = sshll.u32 %s257_s22, 3  ;;  %s762_s10 = sshll.u32 %s1098_s27, 7 }
  0x29   : > { %s1240_s9 = scalar_select %p43_p3, %s1090_s25, %s45_s18  }
  0x2a   : > { %s266_s14 = scalar_lea.hbm %s1354_s0, %s762_s10  ;;  %s261_s15 = scalar_lea.vmem [#allocation3], %s761_s29 }
  0x2b   : > { %s268_s16 = sshll.u32 %s261_s15, 4  ;;  %p1248_p5 = pnand %p872_p11, %p1225_p12  ;;  %s269_s16 = int_to_ptr.vmem [resolvable:$true] %s268_s16 }
  0x2c   : > { %s1255_s18 = scalar_lea.hbm %s1355_s1, %s762_s10  ;;  %s275_s21 = sand.u32 1, %s1102_s28  }
  0x2d   : > { %s258_s27 = scalar_lea.sflag [#allocation4], %s257_s22  ;;  %p960_p7 = pneg %p1248_p5 }
  0x2e   : > { %s971_s11 = scalar_lea.vmem %s269_s16, 128  ;;  %s1107_s19 = smov [#allocation3]  }
  0x2f   : > { %p972_p2 = scmp.ne.s32.totalorder %s269_s16, %s971_s11  ;;  %s976_s13 = sshll.u32 %s1107_s19, 4  ;;  %s977_s13 = int_to_ptr.vmem [resolvable:$false] %s976_s13 }
  0x30   : > { %s978_s15 = scalar_lea.vmem %s977_s13, 256  ;;  %p979_p12 = scmp.lt.s32.totalorder %s269_s16, %s977_s13 }
  0x31   : > { %p974_p6 = pnand %p972_p2, %p960_p7  ;;  %p980_p13 = scmp.lt.s32.totalorder %s978_s15, %s971_s11 }
  0x33   : > { %p975_p9 = pneg %p974_p6  ;;  %p981_p11 = por %p980_p13, %p979_p12 }
  0x35   : > { %p982_p3 = pnand %p981_p11, %p975_p9 }
  0x37   : > { %985 = shalt.err (!%p982_p3)
}
  0x38   : > { %863 = dma.hbm_to_vmem [thread:$0]  (!%p1248_p5), %s266_s14, 128, %s269_s16, %s258_s27  }
  0x39   : > { %s279_s2 = scalar_lea.vmem [#allocation6], %s761_s29  ;;  %s276_s22 = scalar_lea.sflag [#allocation7], %s275_s21 }
  0x3a   : > { %s286_s12 = sshll.u32 %s279_s2, 4  ;;  %s1108_s19 = smov [#allocation6]   ;;  %s287_s12 = int_to_ptr.vmem [resolvable:$true] %s286_s12 }
  0x3b   : > { %s999_s10 = scalar_lea.vmem %s287_s12, 128  ;;  %s1004_s13 = sshll.u32 %s1108_s19, 4  ;;  %s1005_s13 = int_to_ptr.vmem [resolvable:$false] %s1004_s13 }
  0x3c   : > { %p1000_p2 = scmp.ne.s32.totalorder %s287_s12, %s999_s10  ;;  %s1006_s11 = scalar_lea.vmem %s1005_s13, 256 }
  0x3d   : > { %p1007_p9 = scmp.lt.s32.totalorder %s287_s12, %s1005_s13  ;;  %p1008_p12 = scmp.lt.s32.totalorder %s1006_s11, %s999_s10 }
  0x3e   : > { %p1002_p6 = pnand %p1000_p2, %p960_p7 }
  0x3f   : > { %p1009_p13 = por %p1008_p12, %p1007_p9 }
  0x40   : > { %p1003_p10 = pneg %p1002_p6 }
  0x42   : > { %p1010_p11 = pnand %p1009_p13, %p1003_p10 }
  0x44   : > { %1013 = shalt.err (!%p1010_p11)
}
  0x45   : > { %866 = dma.hbm_to_vmem [thread:$0]  (!%p1248_p5), %s1255_s18, 128, %s287_s12, %s276_s22  }
  0x46   : > { %295 = sbr.rel (%p1198_p8) target bundleno = 351 (0x15f), region = 44  ;;  %s1274_s27 = sand.u32 (!%p1198_p8), 1, %s1086_s24  }
  0x47   : > { %s1277_s29 = sshll.u32 (!%p1198_p8), %s1274_s27, 3  ;;  %s298_s14 = scalar_lea.sflag (!%p1198_p8), [#allocation4], %s1274_s27 }
  0x48   : > { %s301_s16 = scalar_lea.vmem (!%p1198_p8), [#allocation3], %s1277_s29 }
  0x4b   : > { %1065 = dma.done.wait (%p1188_p4), %s298_s14, 128  }
  0x4c   : > { %1067 = vsyncadd (%p1188_p4), %s298_s14, 4294967168  ;;  %s306_s8 = sand.u32 1, %s1179_s5   ;;  %s310_s18 = scalar_lea.vmem [#allocation6], %s1277_s29 }
  0x4d   : > { %s307_s17 = scalar_lea.sflag [#allocation7], %s306_s8 }
  0x4e   : > { %1069 = dma.done.wait (%p1188_p4), %s307_s17, 128  }
  0x4f   : > { %1071 = vsyncadd (%p1188_p4), %s307_s17, 4294967168 }
  0x50   : > { %1073 = dma.done.wait (%p59_p1), [#allocation7], 8192  }
  0x51   : > { %1075 = vsyncadd (%p59_p1), [#allocation7], 4294959104  ;;  %v390_v0 = vld [vmem:[#allocation8 + $0xf8] sm:$0xff]  ;;  %v389_v4 = vld [vmem:[#allocation8 + $0xf0] sm:$0xff]  ;;  %v572_v28 = vlaneseq  ;;  %s601_s21 = sld [smem:[#allocation2]]  ;;  %s773_s12 = sshll.u32 %s1094_s26, 7 }
  0x52   : > { %v422_v1 = vld [vmem:[#allocation8 + $0x1f8] sm:$0xff]  ;;  %776 = vmatprep.subr.mxu0 %v390_v0  ;;  %v421_v5 = vld [vmem:[#allocation8 + $0x1f0] sm:$0xff]  ;;  %v388_v8 = vld [vmem:[#allocation8 + $0xe8] sm:$0xff]  ;;  %s350_s22 = scalar_lea.vmem [#allocation9], %s1277_s29  ;;  %s628_s11 = scalar_lea.hbm %s1360_s6, %s773_s12 }
  0x53   : > { %v374_v2 = vld [vmem:[#allocation8 + $0x78] sm:$0xff]  ;;  %811 = vmatprep.subr.mxu1 %v422_v1  ;;  %v373_v6 = vld [vmem:[#allocation8 + $0x70] sm:$0xff]  ;;  %v420_v9 = vld [vmem:[#allocation8 + $0x1e8] sm:$0xff]  ;;  %v573_v37 = vshrl.u32 %v572_v28, 7  ;;  %s630_s10 = sshll.u32 %s350_s22, 4  ;;  %s616_s14 = scalar_lea.sflag [#allocation5], %s1274_s27  ;;  %s631_s10 = int_to_ptr.vmem [resolvable:$true] %s630_s10 }
  0x54   : > { %v406_v3 = vld [vmem:[#allocation8 + $0x178] sm:$0xff]  ;;  %777 = vmatpush3.msra.mxu0 %v374_v2  ;;  %v405_v7 = vld [vmem:[#allocation8 + $0x170] sm:$0xff]  ;;  %v372_v10 = vld [vmem:[#allocation8 + $0x68] sm:$0xff]  ;;  %s1109_s8 = smov [#allocation9]  }
  0x55   : > { %812 = vmatpush3.msra.mxu1 %v406_v3  ;;  %778 = vmatprep.subr.mxu0 %v389_v4  ;;  %v404_v11 = vld [vmem:[#allocation8 + $0x168] sm:$0xff]  ;;  %v387_v12 = vld [vmem:[#allocation8 + $0xe0] sm:$0xff]  ;;  %v386_v16 = vld [vmem:[#allocation8 + $0xd8] sm:$0xff]  ;;  %v574_v46 = vsub.s32 0, %v573_v37  ;;  %v578_v47 = vsub.s32 1, %v573_v37  ;;  %v582_v48 = vsub.s32 2, %v573_v37 }
  0x56   : > { %813 = vmatprep.subr.mxu1 %v421_v5  ;;  %779 = vmatpush3.msra.mxu0 %v373_v6  ;;  %v419_v13 = vld [vmem:[#allocation8 + $0x1e0] sm:$0xff]  ;;  %v418_v17 = vld [vmem:[#allocation8 + $0x1d8] sm:$0xff]  ;;  %v385_v20 = vld [vmem:[#allocation8 + $0xd0] sm:$0xff]  ;;  %v586_v52 = vsub.s32 3, %v573_v37  ;;  %s1018_s17 = sshll.u32 %s1109_s8, 4  ;;  %s1019_s17 = int_to_ptr.vmem [resolvable:$false] %s1018_s17 }
  0x57   : > { %814 = vmatpush3.msra.mxu1 %v405_v7  ;;  %780 = vmatprep.subr.mxu0 %v388_v8  ;;  %v371_v14 = vld [vmem:[#allocation8 + $0x60] sm:$0xff]  ;;  %v370_v18 = vld [vmem:[#allocation8 + $0x58] sm:$0xff]  ;;  %v417_v21 = vld [vmem:[#allocation8 + $0x1d0] sm:$0xff]  ;;  %s1020_s26 = scalar_lea.vmem %s1019_s17, 256  ;;  %p1021_p10 = scmp.lt.s32.totalorder %s631_s10, %s1019_s17 }
  0x58   : > { %815 = vmatprep.subr.mxu1 %v420_v9  ;;  %v403_v15 = vld [vmem:[#allocation8 + $0x160] sm:$0xff]  ;;  %781 = vmatpush3.msra.mxu0 %v372_v10  ;;  %v402_v19 = vld [vmem:[#allocation8 + $0x158] sm:$0xff]  ;;  %v369_v22 = vld [vmem:[#allocation8 + $0x50] sm:$0xff] }
  0x59   : > { %816 = vmatpush3.msra.mxu1 %v404_v11  ;;  %782 = vmatprep.subr.mxu0 %v387_v12  ;;  %v401_v23 = vld [vmem:[#allocation8 + $0x150] sm:$0xff]  ;;  %v384_v24 = vld [vmem:[#allocation8 + $0xc8] sm:$0xff]  ;;  %v383_v29 = vld [vmem:[#allocation8 + $0xc0] sm:$0xff] }
  0x5a   : > { %817 = vmatprep.subr.mxu1 %v419_v13  ;;  %783 = vmatpush3.msra.mxu0 %v371_v14  ;;  %v416_v25 = vld [vmem:[#allocation8 + $0x1c8] sm:$0xff]  ;;  %v415_v30 = vld [vmem:[#allocation8 + $0x1c0] sm:$0xff]  ;;  %v382_v33 = vld [vmem:[#allocation8 + $0xb8] sm:$0xff] }
  0x5b   : > { %818 = vmatpush3.msra.mxu1 %v403_v15  ;;  %784 = vmatprep.subr.mxu0 %v386_v16  ;;  %v368_v26 = vld [vmem:[#allocation8 + $0x48] sm:$0xff]  ;;  %v367_v31 = vld [vmem:[#allocation8 + $0x40] sm:$0xff]  ;;  %v414_v34 = vld [vmem:[#allocation8 + $0x1b8] sm:$0xff] }
  0x5c   : > { %819 = vmatprep.subr.mxu1 %v418_v17  ;;  %785 = vmatpush3.msra.mxu0 %v370_v18  ;;  %v400_v27 = vld [vmem:[#allocation8 + $0x148] sm:$0xff]  ;;  %v399_v32 = vld [vmem:[#allocation8 + $0x140] sm:$0xff]  ;;  %v366_v35 = vld [vmem:[#allocation8 + $0x38] sm:$0xff] }
  0x5d   : > { %820 = vmatpush3.msra.mxu1 %v402_v19  ;;  %786 = vmatprep.subr.mxu0 %v385_v20  ;;  %v398_v36 = vld [vmem:[#allocation8 + $0x138] sm:$0xff]  ;;  %v381_v38 = vld [vmem:[#allocation8 + $0xb0] sm:$0xff]  ;;  %v380_v42 = vld [vmem:[#allocation8 + $0xa8] sm:$0xff] }
  0x5e   : > { %821 = vmatprep.subr.mxu1 %v417_v21  ;;  %787 = vmatpush3.msra.mxu0 %v369_v22  ;;  %v413_v39 = vld [vmem:[#allocation8 + $0x1b0] sm:$0xff]  ;;  %v412_v43 = vld [vmem:[#allocation8 + $0x1a8] sm:$0xff]  ;;  %v379_v49 = vld [vmem:[#allocation8 + $0xa0] sm:$0xff] }
  0x5f   : > { %822 = vmatpush3.msra.mxu1 %v401_v23  ;;  %788 = vmatprep.subr.mxu0 %v384_v24  ;;  %v365_v40 = vld [vmem:[#allocation8 + $0x30] sm:$0xff]  ;;  %v364_v44 = vld [vmem:[#allocation8 + $0x28] sm:$0xff]  ;;  %v411_v50 = vld [vmem:[#allocation8 + $0x1a0] sm:$0xff]  ;;  %v602_v23 = vstv %s601_s21 }
  0x60   : > { %823 = vmatprep.subr.mxu1 %v416_v25  ;;  %789 = vmatpush3.msra.mxu0 %v368_v26  ;;  %v397_v41 = vld [vmem:[#allocation8 + $0x130] sm:$0xff]  ;;  %v396_v45 = vld [vmem:[#allocation8 + $0x128] sm:$0xff]  ;;  %v363_v51 = vld [vmem:[#allocation8 + $0x20] sm:$0xff] }
  0x61   : > { %824 = vmatpush3.msra.mxu1 %v400_v27  ;;  %790 = vmatprep.subr.mxu0 %v383_v29  ;;  %v395_v53 = vld [vmem:[#allocation8 + $0x120] sm:$0xff]  ;;  %v355_v54 = vld [vmem:[%s310_s18] sm:$0xff]  ;;  %v376_v10 = vld [vmem:[#allocation8 + $0x88] sm:$0xff] }
  0x62   : > { %825 = vmatprep.subr.mxu1 %v415_v30  ;;  %791 = vmatpush3.msra.mxu0 %v367_v31  ;;  %v1299_v55 = vld [vmem:[%s301_s16] sm:$0xff]  ;;  %v378_v56 = vld [vmem:[#allocation8 + $0x98] sm:$0xff]  ;;  %v377_v1 = vld [vmem:[#allocation8 + $0x90] sm:$0xff]  ;;  %s1014_s16 = scalar_lea.vmem %s631_s10, 128 }
  0x63   : > { %826 = vmatpush3.msra.mxu1 %v399_v32  ;;  %792 = vmatprep.subr.mxu0 %v382_v33  ;;  %v410_v57 = vld [vmem:[#allocation8 + $0x198] sm:$0xff]  ;;  %v356_v58 = vmul.f32 %v355_v54, %v1299_v55  ;;  %v570_v59 = vld [vmem:[%s1358_s4] sm:$0xf]  ;;  %v409_v2 = vld [vmem:[#allocation8 + $0x190] sm:$0xff]  ;;  %v357_v3 = vsub.f32 %v1299_v55, %v355_v54  ;;  %p1015_p1 = scmp.ne.s32.totalorder %s631_s10, %s1014_s16  ;;  %p1022_p5 = scmp.lt.s32.totalorder %s1020_s26, %s1014_s16 }
  0x64   : > { %827 = vmatprep.subr.mxu1 %v414_v34  ;;  %793 = vmatpush3.msra.mxu0 %v366_v35  ;;  %v362_v60 = vld [vmem:[#allocation8 + $0x18] sm:$0xff]  ;;  %v575_v62 = vrot.slane %v570_v59, %v574_v46  ;;  %v579_v63 = vrot.slane %v570_v59, %v578_v47  ;;  %v583_v0 = vrot.slane %v570_v59, %v582_v48  ;;  %v361_v5 = vld [vmem:[#allocation8 + $0x10] sm:$0xff]  ;;  %v408_v11 = vld [vmem:[#allocation8 + $0x188] sm:$0xff] }
  0x65   : > { %828 = vmatpush3.msra.mxu1 %v398_v36  ;;  %794 = vmatprep.subr.mxu0 %v381_v38  ;;  %v394_v61 = vld [vmem:[#allocation8 + $0x118] sm:$0xff]  ;;  %v587_v4 = vrot.slane %v570_v59, %v586_v52  ;;  %v393_v6 = vld [vmem:[#allocation8 + $0x110] sm:$0xff]  ;;  %v360_v12 = vld [vmem:[#allocation8 + $0x8] sm:$0xff]  ;;  %p1016_p4 = pnand %p1015_p1, %p1231_p0  ;;  %p1023_p7 = por %p1022_p5, %p1021_p10 }
  0x66   : > { %829 = vmatprep.subr.mxu1 %v413_v39  ;;  %795 = vmatpush3.msra.mxu0 %v365_v40  ;;  %v592_v7 = vmul.f32 %v575_v62, %v1299_v55  ;;  %v593_v8 = vmul.f32 %v579_v63, %v355_v54  ;;  %v594_v9 = vmul.f32 %v583_v0, %v356_v58  ;;  %v392_v13 = vld [vmem:[#allocation8 + $0x108] sm:$0xff]  ;;  %v375_v16 = vld [vmem:[#allocation8 + $0x80] sm:$0xff] }
  0x67   : > { %830 = vmatpush3.msra.mxu1 %v397_v41  ;;  %796 = vmatprep.subr.mxu0 %v380_v42  ;;  %v595_v14 = vmul.f32 %v587_v4, %v357_v3  ;;  %v407_v17 = vld [vmem:[#allocation8 + $0x180] sm:$0xff]  ;;  %p1017_p8 = pneg %p1016_p4 }
  0x68   : > { %831 = vmatprep.subr.mxu1 %v412_v43  ;;  %797 = vmatpush3.msra.mxu0 %v364_v44  ;;  %v596_v15 = vadd.f32 %v593_v8, %v592_v7  ;;  %v359_v18 = vld [vmem:[#allocation8] sm:$0xff] }
  0x69   : > { %832 = vmatpush3.msra.mxu1 %v396_v45  ;;  %798 = vmatprep.subr.mxu0 %v379_v49  ;;  %v391_v20 = vld [vmem:[#allocation8 + $0x100] sm:$0xff]  ;;  %p1024_p3 = pnand %p1023_p7, %p1017_p8 }
  0x6a   : > { %833 = vmatprep.subr.mxu1 %v411_v50  ;;  %799 = vmatpush3.msra.mxu0 %v363_v51  ;;  %v597_v19 = vadd.f32 %v596_v15, %v594_v9  ;;  %v770_v34 = vld [vmem:[%s1357_s3] ss:$0 sm:$0xff] }
  0x6b   : > { %834 = vmatpush3.msra.mxu1 %v395_v53  ;;  %800 = vmatprep.subr.mxu0 %v378_v56 }
  0x6c   : > { %835 = vmatprep.subr.mxu1 %v410_v57  ;;  %801 = vmatpush3.msra.mxu0 %v362_v60  ;;  %v598_v21 = vadd.f32 %v597_v19, %v595_v14 }
  0x6d   : > { %836 = vmatpush3.msra.mxu1 %v394_v61  ;;  %802 = vmatprep.subr.mxu0 %v377_v1 }
  0x6e   : > { %837 = vmatprep.subr.mxu1 %v409_v2  ;;  %803 = vmatpush3.msra.mxu0 %v361_v5 }
  0x6f   : > { %838 = vmatpush3.msra.mxu1 %v393_v6  ;;  %804 = vmatprep.subr.mxu0 %v376_v10 }
  0x70   : > { %839 = vmatprep.subr.mxu1 %v408_v11  ;;  %805 = vmatpush3.msra.mxu0 %v360_v12 }
  0x71   : > { %840 = vmatpush3.msra.mxu1 %v392_v13  ;;  %806 = vmatprep.subr.mxu0 %v375_v16 }
  0x72   : > { %841 = vmatprep.subr.mxu1 %v407_v17  ;;  %807 = vmatpush3.msra.mxu0 %v359_v18 }
  0x73   : > { %487 = vmatprep.mubr.f32.mxu0 %v355_v54  ;;  %842 = vmatpush3.msra.mxu1 %v391_v20 }
  0x74   : > { %557 = vmatprep.mubr.f32.mxu1 %v357_v3  ;;  %488 = vmatmul.mubr.f32.vlgmr.msra.gmra.mxu0 %v1299_v55 }
  0x75   : > { %558 = vmatmul.mubr.f32.vlgmr.msra.gmra.mxu1 %v356_v58  ;;  %599 = vadd.xlane.f32.xlu0 %v598_v21 }
  0xfe   : > { %v600_v22 = vpop.xlane.xlu0 %599 }
  0xff   : > { %v603_v24 = vadd.f32 %v602_v23, %v600_v22 }
 0x101   : > { %v771_v25 = vmul.f32 -1.442695, %v603_v24 }
 0x103   : > { %926 = vpow2.f32 %v771_v25 }
 0x110   : > { %v927_v28 = vpop.eup %926 }
 0x111   : > { %v607_v33 = vadd.f32 1.0, %v927_v28 }
 0x113   : > { %928 = vrcp.f32 %v607_v33 }
 0x120   : > { %v929_v37 = vpop.eup %928 }
 0x134   : > { %v808_v26 = vpop.f32.mrf.mxu0 }
 0x135   : > { %v843_v27 = vpop.f32.mrf.mxu1 }
 0x136   : > { %v809_v29 = vpop.f32.mrf.mxu0 }
 0x137   : > { %v844_v30 = vpop.f32.mrf.mxu1  ;;  %v810_v31 = vadd.f32 %v809_v29, %v808_v26 }
 0x138   : > { %v845_v32 = vadd.f32 %v844_v30, %v843_v27 }
 0x13a   : > { %v560_v35 = vadd.f32 %v845_v32, %v810_v31 }
 0x13c   : > { %v569_v36 = vadd.f32 %v770_v34, %v560_v35 }
 0x13e   : > { %930 = vtanh.f32 %v569_v36 }
 0x14b   : > { %v931_v38 = vpop.eup %930 }
 0x14c   : > { %v611_v39 = vsub.f32 %v931_v38, %v1299_v55 }
 0x14e   : > { %v612_v40 = vmul.f32 %v929_v37, %v611_v39 }
 0x150   : > { %v613_v41 = vadd.f32 %v612_v40, %v1299_v55 }
 0x152   : > { %614 = vst [vmem:[%s350_s22] sm:$0xff] %v613_v41 }
 0x153   : > { %1027 = shalt.err (!%p1024_p3)
}
 0x154   : > { %s1028_s29 = scalar_lea.hbm %s628_s11, 128  ;;  %s1032_s5 = scalar_lea.hbm %s1360_s6, 256 }
 0x155   : > { %p1029_p2 = scmp.ne.s32.totalorder %s628_s11, %s1028_s29  ;;  %p1033_p12 = scmp.lt.s32.totalorder %s628_s11, %s1360_s6 }
 0x156   : > { %p1034_p13 = scmp.lt.s32.totalorder %s1032_s5, %s1028_s29 }
 0x157   : > { %p1030_p6 = pnand %p1029_p2, %p1231_p0 }
 0x158   : > { %p1035_p11 = por %p1034_p13, %p1033_p12 }
 0x159   : > { %p1031_p9 = pneg %p1030_p6 }
 0x15b   : > { %p1036_p1 = pnand %p1035_p11, %p1031_p9 }
 0x15d   : > { %1039 = shalt.err (!%p1036_p1)
}
 0x15e   : > { %854 = dma.vmem_to_hbm [thread:$0]  (%p1231_p0), %s631_s10, 128, %s628_s11, %s616_s14  }
 0x15f PF: > { %s642_s15 = sand.u32 1, %s1082_s23   ;;  %p1375_p4 = scmp.ne.s32.totalorder %s1366_s7, 0 }
 0x160   : > { %p1376_p8 = scmp.ge.s32.totalorder %s1102_s28, 2  ;;  %s643_s2 = scalar_lea.sflag [#allocation5], %s642_s15 }
 0x162   : > { %p868_p10 = pnand %p1376_p8, %p1375_p4 }
 0x164   : > { %p869_p5 = pneg %p868_p10 }
 0x166   : > { %1077 = dma.done.wait (%p869_p5), %s643_s2, 128  }
 0x167   : > { %1079 = vsyncadd (%p869_p5), %s643_s2, 4294967168  ;;  %s26_s28 = sadd.s32 1, %s1102_s28   ;;  %s1377_s26 = sld [smem:[#allocation14_spill]] }
 0x168   : > { %p23_p7 = scmp.ge.s32.totalorder %s26_s28, 4   ;;  %s1378_s27 = sld [smem:[#allocation15_spill]] }
 0x169   : > { %s1379_s23 = smov %s1086_s24  ;;  %s1380_s24 = smov %s1090_s25 }
 0x16a   : > { %s1381_s25 = smov %s1240_s9  ;;  %25 = sbr.rel (!%p23_p7) target bundleno = 11 (0xb), region = 110 }
 0x16f   :  { %648 = vsyncpa [#allocation4], 1 }
 0x170   :  { %650 = vsyncpa [#allocation4 + $0x1], 1 }
 0x171   :  { %651 = vsyncpa [#allocation7], 1 }
 0x172   :  { %653 = vsyncpa [#allocation7 + $0x1], 1 }
 0x173   :  { %654 = vsyncpa [#allocation5], 1 }
 0x174   :  { %656 = vsyncpa [#allocation5 + $0x1], 1 }

// kernel: tpu_custom_call.1
= control target key start
LH: loop header
LB: loop body
LE: loop exit
PB: predicated region body
PF: predicated region fallthrough
CT: control target
= control target key end

     0   :  { %s1354_s0 = inlined_call_operand.hbm [shape: f32[16,128], index: 0, kind: input, shape index: {}]   ;;  %s1355_s1 = inlined_call_operand.hbm [shape: f32[16,128], index: 1, kind: input, shape index: {}]   ;;  %s1356_s2 = inlined_call_operand.hbm [shape: f32[512,128], index: 2, kind: input, shape index: {}]   ;;  %s1357_s3 = inlined_call_operand.vmem [shape: f32[1,128], index: 3, kind: input, shape index: {}]   ;;  %s1358_s4 = inlined_call_operand.vmem [shape: f32[1,512], index: 4, kind: input, shape index: {}]   ;;  %s1359_s5 = inlined_call_operand.<no memory space> [shape: f32[1], index: 5, kind: input, shape index: {}]   ;;  %s1360_s6 = inlined_call_operand.hbm [shape: f32[16,128], index: 6, kind: output, shape index: {}]  }
   0x1   :  { %1363 = sst [smem:[#allocation16_spill]] %s1356_s2 }
   0x2   :  { %11 = sst [smem:[#allocation2]] %s1359_s5 }
   0x3   :  { %12 = vsyncpa [#allocation4], 0 }
   0x4   :  { %14 = vsyncpa [#allocation4 + $0x1], 0 }
   0x5   :  { %15 = vsyncpa [#allocation7], 0 }
   0x6   :  { %17 = vsyncpa [#allocation7 + $0x1], 0 }
   0x7   :  { %18 = vsyncpa [#allocation5], 0 }
   0x8   :  { %20 = vsyncpa [#allocation5 + $0x1], 0  ;;  %s1148_s23 = smov 0   ;;  %s1150_s24 = smov 0  }
   0x9   :  { %s1152_s25 = smov 0   ;;  %s1154_s26 = smov 0  }
   0xa   :  { %s1156_s27 = smov 0   ;;  %s1158_s28 = smov 0  }
   0xb LB: > { %1364 = sst [smem:[#allocation14_spill]] %s1098_s27  ;;  %s1179_s5 = sadd.s32 4294967295, %s1102_s28   ;;  %s1102_s28 = sphi %s1158_s28, %s26_s28   ;;  %s1098_s27 = sphi %s1156_s27, %s1378_s27   ;;  %s1094_s26 = sphi %s1154_s26, %s1377_s26   ;;  %s1090_s25 = sphi %s1152_s25, %s1381_s25   ;;  %s1086_s24 = sphi %s1150_s24, %s1380_s24   ;;  %s1082_s23 = sphi %s1148_s23, %s1379_s23  }
   0xc   : > { %s756_s29 = sadd.s32 4294967294, %s1102_s28   ;;  %p58_p0 = scmp.ne.s32.totalorder %s1086_s24, %s1082_s23 }
   0xd   : > { %p59_p1 = scmp.eq.s32.totalorder %s1179_s5, 0  ;;  %p210_p3 = scmp.eq.s32.totalorder %s756_s29, 1 }
   0xe   : > { %p757_p5 = scmp.ge.s32.totalorder %s1102_s28, 1  ;;  %p217_p7 = scmp.lt.s32.totalorder %s1102_s28, 3 }
   0xf   : > { %p1188_p4 = por %p59_p1, %p58_p0  ;;  %p1193_p6 = por %p210_p3, %p58_p0 }
  0x10   : > { %p1198_p8 = pnand %p757_p5, %p217_p7  ;;  %s1104_s9 = smov [#allocation8]  }
  0x11   : > { %s1366_s7 = scalar_select %p1193_p6, 1, 0 }
  0x12   : > { %s231_s10 = sshll.u32 %s1104_s9, 4  ;;  %p856_p9 = pneg %p1198_p8  ;;  %s232_s10 = int_to_ptr.vmem [resolvable:$true] %s231_s10 }
  0x13   : > { %s38_s12 = sadd.s32 1, %s1098_s27  ;;  %s943_s13 = scalar_lea.vmem %s232_s10, 8192 }
  0x14   : > { %p1207_p11 = pnand %p856_p9, %p59_p1  ;;  %p944_p13 = scmp.ne.s32.totalorder %s232_s10, %s943_s13 }
  0x15   : > { %p951_p5 = scmp.lt.s32.totalorder %s232_s10, %s232_s10  ;;  %p952_p7 = scmp.lt.s32.totalorder %s943_s13, %s943_s13 }
  0x16   : > { %p934_p12 = pneg %p1207_p11 }
  0x17   : > { %p953_p2 = por %p952_p7, %p951_p5 }
  0x18   : > { %p946_p0 = pnand %p944_p13, %p934_p12 }
  0x1a   : > { %p947_p3 = pneg %p946_p0 }
  0x1c   : > { %p954_p6 = pnand %p953_p2, %p947_p3 }
  0x1e   : > { %957 = shalt.err (!%p954_p6)
}
  0x1f   : > { %s1105_s14 = smov 128   ;;  %s1106_s15 = smov 8  }
  0x20   : > { %s1369_s2 = sld [smem:[#allocation16_spill]]  ;;  %p40_p2 = scmp.ge.s32.totalorder %s38_s12, 2 }
  0x21   : > { %s45_s18 = sadd.s32 1, %s1090_s25  ;;  %p52_p6 = scmp.ne.s32.totalorder %s1090_s25, %s1086_s24 }
  0x22   : > { %p53_p9 = scmp.eq.s32.totalorder %s1102_s28, 0  ;;  %s1383_s12 = smov (%p40_p2, %s38_s12), 0 }
  0x23   : > { %1370 = sst [smem:[#allocation15_spill]] %s1383_s12  ;;  %p1372_p13 = scmp.eq.s32.totalorder %s1179_s5, 1 }
  0x24   : > { %p1225_p12 = por %p53_p9, %p52_p6  ;;  %s42_s21 = ssub.s32 %s1098_s27, %s1383_s12 }
  0x25   : > { %p1231_p0 = por %p1372_p13, %p52_p6  ;;  %p43_p3 = scmp.eq.s32.totalorder %s42_s21, 0 }
  0x26   : > { %859 = dma.hbm_to_vmem [thread:$0]  (!%p1207_p11), %s1369_s2, 8192, %s232_s10, [#allocation7], %s1105_s14, %s1105_s14, %s1106_s15  }
  0x27   : > { %p872_p11 = scmp.lt.s32.totalorder %s1102_s28, 2  ;;  %s257_s22 = sand.u32 1, %s1090_s25  }
  0x28   : > { %s761_s29 = sshll.u32 %s257_s22, 3  ;;  %s762_s10 = sshll.u32 %s1098_s27, 7 }
  0x29   : > { %s1240_s9 = scalar_select %p43_p3, %s1090_s25, %s45_s18  }
  0x2a   : > { %s266_s14 = scalar_lea.hbm %s1354_s0, %s762_s10  ;;  %s261_s15 = scalar_lea.vmem [#allocation3], %s761_s29 }
  0x2b   : > { %s268_s16 = sshll.u32 %s261_s15, 4  ;;  %p1248_p5 = pnand %p872_p11, %p1225_p12  ;;  %s269_s16 = int_to_ptr.vmem [resolvable:$true] %s268_s16 }
  0x2c   : > { %s1255_s18 = scalar_lea.hbm %s1355_s1, %s762_s10  ;;  %s275_s21 = sand.u32 1, %s1102_s28  }
  0x2d   : > { %s258_s27 = scalar_lea.sflag [#allocation4], %s257_s22  ;;  %p960_p7 = pneg %p1248_p5 }
  0x2e   : > { %s971_s11 = scalar_lea.vmem %s269_s16, 128  ;;  %s1107_s19 = smov [#allocation3]  }
  0x2f   : > { %p972_p2 = scmp.ne.s32.totalorder %s269_s16, %s971_s11  ;;  %s976_s13 = sshll.u32 %s1107_s19, 4  ;;  %s977_s13 = int_to_ptr.vmem [resolvable:$false] %s976_s13 }
  0x30   : > { %s978_s15 = scalar_lea.vmem %s977_s13, 256  ;;  %p979_p12 = scmp.lt.s32.totalorder %s269_s16, %s977_s13 }
  0x31   : > { %p974_p6 = pnand %p972_p2, %p960_p7  ;;  %p980_p13 = scmp.lt.s32.totalorder %s978_s15, %s971_s11 }
  0x33   : > { %p975_p9 = pneg %p974_p6  ;;  %p981_p11 = por %p980_p13, %p979_p12 }
  0x35   : > { %p982_p3 = pnand %p981_p11, %p975_p9 }
  0x37   : > { %985 = shalt.err (!%p982_p3)
}
  0x38   : > { %863 = dma.hbm_to_vmem [thread:$0]  (!%p1248_p5), %s266_s14, 128, %s269_s16, %s258_s27  }
  0x39   : > { %s279_s2 = scalar_lea.vmem [#allocation6], %s761_s29  ;;  %s276_s22 = scalar_lea.sflag [#allocation7], %s275_s21 }
  0x3a   : > { %s286_s12 = sshll.u32 %s279_s2, 4  ;;  %s1108_s19 = smov [#allocation6]   ;;  %s287_s12 = int_to_ptr.vmem [resolvable:$true] %s286_s12 }
  0x3b   : > { %s999_s10 = scalar_lea.vmem %s287_s12, 128  ;;  %s1004_s13 = sshll.u32 %s1108_s19, 4  ;;  %s1005_s13 = int_to_ptr.vmem [resolvable:$false] %s1004_s13 }
  0x3c   : > { %p1000_p2 = scmp.ne.s32.totalorder %s287_s12, %s999_s10  ;;  %s1006_s11 = scalar_lea.vmem %s1005_s13, 256 }
  0x3d   : > { %p1007_p9 = scmp.lt.s32.totalorder %s287_s12, %s1005_s13  ;;  %p1008_p12 = scmp.lt.s32.totalorder %s1006_s11, %s999_s10 }
  0x3e   : > { %p1002_p6 = pnand %p1000_p2, %p960_p7 }
  0x3f   : > { %p1009_p13 = por %p1008_p12, %p1007_p9 }
  0x40   : > { %p1003_p10 = pneg %p1002_p6 }
  0x42   : > { %p1010_p11 = pnand %p1009_p13, %p1003_p10 }
  0x44   : > { %1013 = shalt.err (!%p1010_p11)
}
  0x45   : > { %866 = dma.hbm_to_vmem [thread:$0]  (!%p1248_p5), %s1255_s18, 128, %s287_s12, %s276_s22  }
  0x46   : > { %295 = sbr.rel (%p1198_p8) target bundleno = 351 (0x15f), region = 44  ;;  %s1274_s27 = sand.u32 (!%p1198_p8), 1, %s1086_s24  }
  0x47   : > { %s1277_s29 = sshll.u32 (!%p1198_p8), %s1274_s27, 3  ;;  %s298_s14 = scalar_lea.sflag (!%p1198_p8), [#allocation4], %s1274_s27 }
  0x48   : > { %s301_s16 = scalar_lea.vmem (!%p1198_p8), [#allocation3], %s1277_s29 }
  0x4b   : > { %1065 = dma.done.wait (%p1188_p4), %s298_s14, 128  }
  0x4c   : > { %1067 = vsyncadd (%p1188_p4), %s298_s14, 4294967168  ;;  %s306_s8 = sand.u32 1, %s1179_s5   ;;  %s310_s18 = scalar_lea.vmem [#allocation6], %s1277_s29 }
  0x4d   : > { %s307_s17 = scalar_lea.sflag [#allocation7], %s306_s8 }
  0x4e   : > { %1069 = dma.done.wait (%p1188_p4), %s307_s17, 128  }
  0x4f   : > { %1071 = vsyncadd (%p1188_p4), %s307_s17, 4294967168 }
  0x50   : > { %1073 = dma.done.wait (%p59_p1), [#allocation7], 8192  }
  0x51   : > { %1075 = vsyncadd (%p59_p1), [#allocation7], 4294959104  ;;  %v390_v0 = vld [vmem:[#allocation8 + $0xf8] sm:$0xff]  ;;  %v389_v4 = vld [vmem:[#allocation8 + $0xf0] sm:$0xff]  ;;  %v572_v28 = vlaneseq  ;;  %s601_s21 = sld [smem:[#allocation2]]  ;;  %s773_s12 = sshll.u32 %s1094_s26, 7 }
  0x52   : > { %v422_v1 = vld [vmem:[#allocation8 + $0x1f8] sm:$0xff]  ;;  %776 = vmatprep.subr.mxu0 %v390_v0  ;;  %v421_v5 = vld [vmem:[#allocation8 + $0x1f0] sm:$0xff]  ;;  %v388_v8 = vld [vmem:[#allocation8 + $0xe8] sm:$0xff]  ;;  %s350_s22 = scalar_lea.vmem [#allocation9], %s1277_s29  ;;  %s628_s11 = scalar_lea.hbm %s1360_s6, %s773_s12 }
  0x53   : > { %v374_v2 = vld [vmem:[#allocation8 + $0x78] sm:$0xff]  ;;  %811 = vmatprep.subr.mxu1 %v422_v1  ;;  %v373_v6 = vld [vmem:[#allocation8 + $0x70] sm:$0xff]  ;;  %v420_v9 = vld [vmem:[#allocation8 + $0x1e8] sm:$0xff]  ;;  %v573_v37 = vshrl.u32 %v572_v28, 7  ;;  %s630_s10 = sshll.u32 %s350_s22, 4  ;;  %s616_s14 = scalar_lea.sflag [#allocation5], %s1274_s27  ;;  %s631_s10 = int_to_ptr.vmem [resolvable:$true] %s630_s10 }
  0x54   : > { %v406_v3 = vld [vmem:[#allocation8 + $0x178] sm:$0xff]  ;;  %777 = vmatpush3.msra.mxu0 %v374_v2  ;;  %v405_v7 = vld [vmem:[#allocation8 + $0x170] sm:$0xff]  ;;  %v372_v10 = vld [vmem:[#allocation8 + $0x68] sm:$0xff]  ;;  %s1109_s8 = smov [#allocation9]  }
  0x55   : > { %812 = vmatpush3.msra.mxu1 %v406_v3  ;;  %778 = vmatprep.subr.mxu0 %v389_v4  ;;  %v404_v11 = vld [vmem:[#allocation8 + $0x168] sm:$0xff]  ;;  %v387_v12 = vld [vmem:[#allocation8 + $0xe0] sm:$0xff]  ;;  %v386_v16 = vld [vmem:[#allocation8 + $0xd8] sm:$0xff]  ;;  %v574_v46 = vsub.s32 0, %v573_v37  ;;  %v578_v47 = vsub.s32 1, %v573_v37  ;;  %v582_v48 = vsub.s32 2, %v573_v37 }
  0x56   : > { %813 = vmatprep.subr.mxu1 %v421_v5  ;;  %779 = vmatpush3.msra.mxu0 %v373_v6  ;;  %v419_v13 = vld [vmem:[#allocation8 + $0x1e0] sm:$0xff]  ;;  %v418_v17 = vld [vmem:[#allocation8 + $0x1d8] sm:$0xff]  ;;  %v385_v20 = vld [vmem:[#allocation8 + $0xd0] sm:$0xff]  ;;  %v586_v52 = vsub.s32 3, %v573_v37  ;;  %s1018_s17 = sshll.u32 %s1109_s8, 4  ;;  %s1019_s17 = int_to_ptr.vmem [resolvable:$false] %s1018_s17 }
  0x57   : > { %814 = vmatpush3.msra.mxu1 %v405_v7  ;;  %780 = vmatprep.subr.mxu0 %v388_v8  ;;  %v371_v14 = vld [vmem:[#allocation8 + $0x60] sm:$0xff]  ;;  %v370_v18 = vld [vmem:[#allocation8 + $0x58] sm:$0xff]  ;;  %v417_v21 = vld [vmem:[#allocation8 + $0x1d0] sm:$0xff]  ;;  %s1020_s26 = scalar_lea.vmem %s1019_s17, 256  ;;  %p1021_p10 = scmp.lt.s32.totalorder %s631_s10, %s1019_s17 }
  0x58   : > { %815 = vmatprep.subr.mxu1 %v420_v9  ;;  %v403_v15 = vld [vmem:[#allocation8 + $0x160] sm:$0xff]  ;;  %781 = vmatpush3.msra.mxu0 %v372_v10  ;;  %v402_v19 = vld [vmem:[#allocation8 + $0x158] sm:$0xff]  ;;  %v369_v22 = vld [vmem:[#allocation8 + $0x50] sm:$0xff] }
  0x59   : > { %816 = vmatpush3.msra.mxu1 %v404_v11  ;;  %782 = vmatprep.subr.mxu0 %v387_v12  ;;  %v401_v23 = vld [vmem:[#allocation8 + $0x150] sm:$0xff]  ;;  %v384_v24 = vld [vmem:[#allocation8 + $0xc8] sm:$0xff]  ;;  %v383_v29 = vld [vmem:[#allocation8 + $0xc0] sm:$0xff] }
  0x5a   : > { %817 = vmatprep.subr.mxu1 %v419_v13  ;;  %783 = vmatpush3.msra.mxu0 %v371_v14  ;;  %v416_v25 = vld [vmem:[#allocation8 + $0x1c8] sm:$0xff]  ;;  %v415_v30 = vld [vmem:[#allocation8 + $0x1c0] sm:$0xff]  ;;  %v382_v33 = vld [vmem:[#allocation8 + $0xb8] sm:$0xff] }
  0x5b   : > { %818 = vmatpush3.msra.mxu1 %v403_v15  ;;  %784 = vmatprep.subr.mxu0 %v386_v16  ;;  %v368_v26 = vld [vmem:[#allocation8 + $0x48] sm:$0xff]  ;;  %v367_v31 = vld [vmem:[#allocation8 + $0x40] sm:$0xff]  ;;  %v414_v34 = vld [vmem:[#allocation8 + $0x1b8] sm:$0xff] }
  0x5c   : > { %819 = vmatprep.subr.mxu1 %v418_v17  ;;  %785 = vmatpush3.msra.mxu0 %v370_v18  ;;  %v400_v27 = vld [vmem:[#allocation8 + $0x148] sm:$0xff]  ;;  %v399_v32 = vld [vmem:[#allocation8 + $0x140] sm:$0xff]  ;;  %v366_v35 = vld [vmem:[#allocation8 + $0x38] sm:$0xff] }
  0x5d   : > { %820 = vmatpush3.msra.mxu1 %v402_v19  ;;  %786 = vmatprep.subr.mxu0 %v385_v20  ;;  %v398_v36 = vld [vmem:[#allocation8 + $0x138] sm:$0xff]  ;;  %v381_v38 = vld [vmem:[#allocation8 + $0xb0] sm:$0xff]  ;;  %v380_v42 = vld [vmem:[#allocation8 + $0xa8] sm:$0xff] }
  0x5e   : > { %821 = vmatprep.subr.mxu1 %v417_v21  ;;  %787 = vmatpush3.msra.mxu0 %v369_v22  ;;  %v413_v39 = vld [vmem:[#allocation8 + $0x1b0] sm:$0xff]  ;;  %v412_v43 = vld [vmem:[#allocation8 + $0x1a8] sm:$0xff]  ;;  %v379_v49 = vld [vmem:[#allocation8 + $0xa0] sm:$0xff] }
  0x5f   : > { %822 = vmatpush3.msra.mxu1 %v401_v23  ;;  %788 = vmatprep.subr.mxu0 %v384_v24  ;;  %v365_v40 = vld [vmem:[#allocation8 + $0x30] sm:$0xff]  ;;  %v364_v44 = vld [vmem:[#allocation8 + $0x28] sm:$0xff]  ;;  %v411_v50 = vld [vmem:[#allocation8 + $0x1a0] sm:$0xff]  ;;  %v602_v23 = vstv %s601_s21 }
  0x60   : > { %823 = vmatprep.subr.mxu1 %v416_v25  ;;  %789 = vmatpush3.msra.mxu0 %v368_v26  ;;  %v397_v41 = vld [vmem:[#allocation8 + $0x130] sm:$0xff]  ;;  %v396_v45 = vld [vmem:[#allocation8 + $0x128] sm:$0xff]  ;;  %v363_v51 = vld [vmem:[#allocation8 + $0x20] sm:$0xff] }
  0x61   : > { %824 = vmatpush3.msra.mxu1 %v400_v27  ;;  %790 = vmatprep.subr.mxu0 %v383_v29  ;;  %v395_v53 = vld [vmem:[#allocation8 + $0x120] sm:$0xff]  ;;  %v355_v54 = vld [vmem:[%s310_s18] sm:$0xff]  ;;  %v376_v10 = vld [vmem:[#allocation8 + $0x88] sm:$0xff] }
  0x62   : > { %825 = vmatprep.subr.mxu1 %v415_v30  ;;  %791 = vmatpush3.msra.mxu0 %v367_v31  ;;  %v1299_v55 = vld [vmem:[%s301_s16] sm:$0xff]  ;;  %v378_v56 = vld [vmem:[#allocation8 + $0x98] sm:$0xff]  ;;  %v377_v1 = vld [vmem:[#allocation8 + $0x90] sm:$0xff]  ;;  %s1014_s16 = scalar_lea.vmem %s631_s10, 128 }
  0x63   : > { %826 = vmatpush3.msra.mxu1 %v399_v32  ;;  %792 = vmatprep.subr.mxu0 %v382_v33  ;;  %v410_v57 = vld [vmem:[#allocation8 + $0x198] sm:$0xff]  ;;  %v356_v58 = vmul.f32 %v355_v54, %v1299_v55  ;;  %v570_v59 = vld [vmem:[%s1358_s4] sm:$0xf]  ;;  %v409_v2 = vld [vmem:[#allocation8 + $0x190] sm:$0xff]  ;;  %v357_v3 = vsub.f32 %v1299_v55, %v355_v54  ;;  %p1015_p1 = scmp.ne.s32.totalorder %s631_s10, %s1014_s16  ;;  %p1022_p5 = scmp.lt.s32.totalorder %s1020_s26, %s1014_s16 }
  0x64   : > { %827 = vmatprep.subr.mxu1 %v414_v34  ;;  %793 = vmatpush3.msra.mxu0 %v366_v35  ;;  %v362_v60 = vld [vmem:[#allocation8 + $0x18] sm:$0xff]  ;;  %v575_v62 = vrot.slane %v570_v59, %v574_v46  ;;  %v579_v63 = vrot.slane %v570_v59, %v578_v47  ;;  %v583_v0 = vrot.slane %v570_v59, %v582_v48  ;;  %v361_v5 = vld [vmem:[#allocation8 + $0x10] sm:$0xff]  ;;  %v408_v11 = vld [vmem:[#allocation8 + $0x188] sm:$0xff] }
  0x65   : > { %828 = vmatpush3.msra.mxu1 %v398_v36  ;;  %794 = vmatprep.subr.mxu0 %v381_v38  ;;  %v394_v61 = vld [vmem:[#allocation8 + $0x118] sm:$0xff]  ;;  %v587_v4 = vrot.slane %v570_v59, %v586_v52  ;;  %v393_v6 = vld [vmem:[#allocation8 + $0x110] sm:$0xff]  ;;  %v360_v12 = vld [vmem:[#allocation8 + $0x8] sm:$0xff]  ;;  %p1016_p4 = pnand %p1015_p1, %p1231_p0  ;;  %p1023_p7 = por %p1022_p5, %p1021_p10 }
  0x66   : > { %829 = vmatprep.subr.mxu1 %v413_v39  ;;  %795 = vmatpush3.msra.mxu0 %v365_v40  ;;  %v592_v7 = vmul.f32 %v575_v62, %v1299_v55  ;;  %v593_v8 = vmul.f32 %v579_v63, %v355_v54  ;;  %v594_v9 = vmul.f32 %v583_v0, %v356_v58  ;;  %v392_v13 = vld [vmem:[#allocation8 + $0x108] sm:$0xff]  ;;  %v375_v16 = vld [vmem:[#allocation8 + $0x80] sm:$0xff] }
  0x67   : > { %830 = vmatpush3.msra.mxu1 %v397_v41  ;;  %796 = vmatprep.subr.mxu0 %v380_v42  ;;  %v595_v14 = vmul.f32 %v587_v4, %v357_v3  ;;  %v407_v17 = vld [vmem:[#allocation8 + $0x180] sm:$0xff]  ;;  %p1017_p8 = pneg %p1016_p4 }
  0x68   : > { %831 = vmatprep.subr.mxu1 %v412_v43  ;;  %797 = vmatpush3.msra.mxu0 %v364_v44  ;;  %v596_v15 = vadd.f32 %v593_v8, %v592_v7  ;;  %v359_v18 = vld [vmem:[#allocation8] sm:$0xff] }
  0x69   : > { %832 = vmatpush3.msra.mxu1 %v396_v45  ;;  %798 = vmatprep.subr.mxu0 %v379_v49  ;;  %v391_v20 = vld [vmem:[#allocation8 + $0x100] sm:$0xff]  ;;  %p1024_p3 = pnand %p1023_p7, %p1017_p8 }
  0x6a   : > { %833 = vmatprep.subr.mxu1 %v411_v50  ;;  %799 = vmatpush3.msra.mxu0 %v363_v51  ;;  %v597_v19 = vadd.f32 %v596_v15, %v594_v9  ;;  %v770_v34 = vld [vmem:[%s1357_s3] ss:$0 sm:$0xff] }
  0x6b   : > { %834 = vmatpush3.msra.mxu1 %v395_v53  ;;  %800 = vmatprep.subr.mxu0 %v378_v56 }
  0x6c   : > { %835 = vmatprep.subr.mxu1 %v410_v57  ;;  %801 = vmatpush3.msra.mxu0 %v362_v60  ;;  %v598_v21 = vadd.f32 %v597_v19, %v595_v14 }
  0x6d   : > { %836 = vmatpush3.msra.mxu1 %v394_v61  ;;  %802 = vmatprep.subr.mxu0 %v377_v1 }
  0x6e   : > { %837 = vmatprep.subr.mxu1 %v409_v2  ;;  %803 = vmatpush3.msra.mxu0 %v361_v5 }
  0x6f   : > { %838 = vmatpush3.msra.mxu1 %v393_v6  ;;  %804 = vmatprep.subr.mxu0 %v376_v10 }
  0x70   : > { %839 = vmatprep.subr.mxu1 %v408_v11  ;;  %805 = vmatpush3.msra.mxu0 %v360_v12 }
  0x71   : > { %840 = vmatpush3.msra.mxu1 %v392_v13  ;;  %806 = vmatprep.subr.mxu0 %v375_v16 }
  0x72   : > { %841 = vmatprep.subr.mxu1 %v407_v17  ;;  %807 = vmatpush3.msra.mxu0 %v359_v18 }
  0x73   : > { %487 = vmatprep.mubr.f32.mxu0 %v355_v54  ;;  %842 = vmatpush3.msra.mxu1 %v391_v20 }
  0x74   : > { %557 = vmatprep.mubr.f32.mxu1 %v357_v3  ;;  %488 = vmatmul.mubr.f32.vlgmr.msra.gmra.mxu0 %v1299_v55 }
  0x75   : > { %558 = vmatmul.mubr.f32.vlgmr.msra.gmra.mxu1 %v356_v58  ;;  %599 = vadd.xlane.f32.xlu0 %v598_v21 }
  0xfe   : > { %v600_v22 = vpop.xlane.xlu0 %599 }
  0xff   : > { %v603_v24 = vadd.f32 %v602_v23, %v600_v22 }
 0x101   : > { %v771_v25 = vmul.f32 -1.442695, %v603_v24 }
 0x103   : > { %926 = vpow2.f32 %v771_v25 }
 0x110   : > { %v927_v28 = vpop.eup %926 }
 0x111   : > { %v607_v33 = vadd.f32 1.0, %v927_v28 }
 0x113   : > { %928 = vrcp.f32 %v607_v33 }
 0x120   : > { %v929_v37 = vpop.eup %928 }
 0x134   : > { %v808_v26 = vpop.f32.mrf.mxu0 }
 0x135   : > { %v843_v27 = vpop.f32.mrf.mxu1 }
 0x136   : > { %v809_v29 = vpop.f32.mrf.mxu0 }
 0x137   : > { %v844_v30 = vpop.f32.mrf.mxu1  ;;  %v810_v31 = vadd.f32 %v809_v29, %v808_v26 }
 0x138   : > { %v845_v32 = vadd.f32 %v844_v30, %v843_v27 }
 0x13a   : > { %v560_v35 = vadd.f32 %v845_v32, %v810_v31 }
 0x13c   : > { %v569_v36 = vadd.f32 %v770_v34, %v560_v35 }
 0x13e   : > { %930 = vtanh.f32 %v569_v36 }
 0x14b   : > { %v931_v38 = vpop.eup %930 }
 0x14c   : > { %v611_v39 = vsub.f32 %v931_v38, %v1299_v55 }
 0x14e   : > { %v612_v40 = vmul.f32 %v929_v37, %v611_v39 }
 0x150   : > { %v613_v41 = vadd.f32 %v612_v40, %v1299_v55 }
 0x152   : > { %614 = vst [vmem:[%s350_s22] sm:$0xff] %v613_v41 }
 0x153   : > { %1027 = shalt.err (!%p1024_p3)
}
 0x154   : > { %s1028_s29 = scalar_lea.hbm %s628_s11, 128  ;;  %s1032_s5 = scalar_lea.hbm %s1360_s6, 256 }
 0x155   : > { %p1029_p2 = scmp.ne.s32.totalorder %s628_s11, %s1028_s29  ;;  %p1033_p12 = scmp.lt.s32.totalorder %s628_s11, %s1360_s6 }
 0x156   : > { %p1034_p13 = scmp.lt.s32.totalorder %s1032_s5, %s1028_s29 }
 0x157   : > { %p1030_p6 = pnand %p1029_p2, %p1231_p0 }
 0x158   : > { %p1035_p11 = por %p1034_p13, %p1033_p12 }
 0x159   : > { %p1031_p9 = pneg %p1030_p6 }
 0x15b   : > { %p1036_p1 = pnand %p1035_p11, %p1031_p9 }
 0x15d   : > { %1039 = shalt.err (!%p1036_p1)
}
 0x15e   : > { %854 = dma.vmem_to_hbm [thread:$0]  (%p1231_p0), %s631_s10, 128, %s628_s11, %s616_s14  }
 0x15f PF: > { %s642_s15 = sand.u32 1, %s1082_s23   ;;  %p1375_p4 = scmp.ne.s32.totalorder %s1366_s7, 0 }
 0x160   : > { %p1376_p8 = scmp.ge.s32.totalorder %s1102_s28, 2  ;;  %s643_s2 = scalar_lea.sflag [#allocation5], %s642_s15 }
 0x162   : > { %p868_p10 = pnand %p1376_p8, %p1375_p4 }
 0x164   : > { %p869_p5 = pneg %p868_p10 }
 0x166   : > { %1077 = dma.done.wait (%p869_p5), %s643_s2, 128  }
 0x167   : > { %1079 = vsyncadd (%p869_p5), %s643_s2, 4294967168  ;;  %s26_s28 = sadd.s32 1, %s1102_s28   ;;  %s1377_s26 = sld [smem:[#allocation14_spill]] }
 0x168   : > { %p23_p7 = scmp.ge.s32.totalorder %s26_s28, 4   ;;  %s1378_s27 = sld [smem:[#allocation15_spill]] }
 0x169   : > { %s1379_s23 = smov %s1086_s24  ;;  %s1380_s24 = smov %s1090_s25 }
 0x16a   : > { %s1381_s25 = smov %s1240_s9  ;;  %25 = sbr.rel (!%p23_p7) target bundleno = 11 (0xb), region = 110 }
 0x16f   :  { %648 = vsyncpa [#allocation4], 1 }
 0x170   :  { %650 = vsyncpa [#allocation4 + $0x1], 1 }
 0x171   :  { %651 = vsyncpa [#allocation7], 1 }
 0x172   :  { %653 = vsyncpa [#allocation7 + $0x1], 1 }
 0x173   :  { %654 = vsyncpa [#allocation5], 1 }
 0x174   :  { %656 = vsyncpa [#allocation5 + $0x1], 1 }

</bundles_post_ra>
